<compile_context>
chip_gen: v7x
topology: tpu7x:2x2x1
jax: 0.10.0
libtpu: 0.0.40
codegen_flags: <defaults>
</compile_context>

<pallas_src>
import math
import functools

import jax
import jax.numpy as jnp
from jax.experimental import pallas as pl
from jax.experimental.pallas import tpu as pltpu


def _round_up(x, m):
    return ((x + m - 1) // m) * m


# ----------------------------------------------------------------------------
# Pallas kernels
# ----------------------------------------------------------------------------

def _matmul_bn_kernel(a_ref, b_ref, s_ref, c_ref, o_ref, acc_ref, *, relu):
    # Grid = (M tiles, N tiles, K tiles); K is the innermost reduction axis.
    k = pl.program_id(2)

    @pl.when(k == 0)
    def _():
        acc_ref[...] = jnp.zeros_like(acc_ref)

    acc_ref[...] += jnp.dot(a_ref[...], b_ref[...],
                            preferred_element_type=jnp.float32)

    @pl.when(k == pl.num_programs(2) - 1)
    def _():
        y = acc_ref[...] * s_ref[...] + c_ref[...]          # folded BatchNorm affine
        if relu:
            y = jnp.maximum(y, 0.0)
        o_ref[...] = y.astype(o_ref.dtype)


def _matmul_bn_res_kernel(a_ref, b_ref, s_ref, c_ref, r_ref, o_ref, acc_ref, *, relu):
    # Same as above but with a residual add before the ReLU (ResNet basic block).
    k = pl.program_id(2)

    @pl.when(k == 0)
    def _():
        acc_ref[...] = jnp.zeros_like(acc_ref)

    acc_ref[...] += jnp.dot(a_ref[...], b_ref[...],
                            preferred_element_type=jnp.float32)

    @pl.when(k == pl.num_programs(2) - 1)
    def _():
        y = acc_ref[...] * s_ref[...] + c_ref[...]
        y = y + r_ref[...].astype(jnp.float32)
        if relu:
            y = jnp.maximum(y, 0.0)
        o_ref[...] = y.astype(o_ref.dtype)


def _maxpool_kernel(p_ref, o_ref):
    # p: (taps, tm, C).  Tree of lane-dense maximums over the tap slabs
    # (pure VPU work; no XLU axis reduction, no sublane padding from a middle dim).
    m = p_ref[0]
    for t in range(1, p_ref.shape[0]):
        m = jnp.maximum(m, p_ref[t])
    o_ref[...] = m


def _pool_head_kernel(x_ref, w_ref, b_ref, o_ref, *, inv_hw):
    # Fused: global average pool + [alpha | fc] matmul + sigmoid gating.
    # w_ref packs alpha_w in lane 0 and fc_w in lanes 1..num_classes (rest zero),
    # so the head is ONE lane-dense (C, 128) matmul and one unmasked 128-lane store.
    feat = jnp.sum(x_ref[...].astype(jnp.float32), axis=1) * inv_hw      # (B, C)
    z = jnp.dot(feat, w_ref[...], preferred_element_type=jnp.float32) + b_ref[...]
    att = jax.nn.sigmoid(z[:, 0:1])                                      # (B, 1)
    lane = jax.lax.broadcasted_iota(jnp.int32, z.shape, 1)
    # lane 0 carries the raw attention weight, lanes >=1 carry att * logits.
    o_ref[...] = jnp.where(lane == 0, att, att * z)


# ----------------------------------------------------------------------------
# Pallas wrappers
# ----------------------------------------------------------------------------

_VMEM = pl.BlockSpec(memory_space=pltpu.MemorySpace.VMEM)


def matmul_bn_pallas(a, b, scale, bias, residual=None, relu=True,
                     out_dtype=jnp.bfloat16):
    """a:(M,K) @ b:(K,N) with per-output-channel folded-BN scale/bias,
    optional residual and ReLU.  bf16 MXU operands, f32 accumulation."""
    M, K = a.shape
    N = b.shape[1]

    # --- tile selection -------------------------------------------------
    tm = min(256, _round_up(M, 8))                     # bigger M tile -> fewer grid steps
    M_pad = _round_up(M, tm)
    K_pad = _round_up(K, 128)
    if K_pad <= 2048:
        tk = K_pad                                     # small K: single reduction step
    else:                                              # deep layers: tile K for VMEM/pipelining
        tk = next(t for t in (1024, 512, 256, 128) if K_pad % t == 0)
    # ResNet-18 output channels are <= 512: keep the full N per tile so the A tile
    # is fetched exactly once and every store is as lane-dense as possible.
    if N <= 512:
        tn = N
    else:
        tn = next(t for t in (512, 256, 128) if N % t == 0)
    nm, nn, nk = M_pad // tm, N // tn, K_pad // tk

    # --- operand prep (bf16; zero padding only when needed, pads contribute 0) ---
    a_p = a.astype(jnp.bfloat16)
    if M_pad != M or K_pad != K:
        a_p = jnp.pad(a_p, ((0, M_pad - M), (0, K_pad - K)))
    b_p = b.astype(jnp.bfloat16)
    if K_pad != K:
        b_p = jnp.pad(b_p, ((0, K_pad - K), (0, 0)))
    s2 = scale.reshape(1, N).astype(jnp.float32)
    c2 = bias.reshape(1, N).astype(jnp.float32)

    in_specs = [
        pl.BlockSpec((tm, tk), lambda i, j, k: (i, k)),
        pl.BlockSpec((tk, tn), lambda i, j, k: (k, j)),
        pl.BlockSpec((1, tn), lambda i, j, k: (0, j)),
        pl.BlockSpec((1, tn), lambda i, j, k: (0, j)),
    ]
    args = [a_p, b_p, s2, c2]
    if residual is not None:
        r_p = residual.astype(jnp.bfloat16)
        if M_pad != M:
            r_p = jnp.pad(r_p, ((0, M_pad - M), (0, 0)))
        in_specs.append(pl.BlockSpec((tm, tn), lambda i, j, k: (i, j)))
        args.append(r_p)
        kernel = functools.partial(_matmul_bn_res_kernel, relu=relu)
    else:
        kernel = functools.partial(_matmul_bn_kernel, relu=relu)

    bytes_accessed = int(a_p.size * 2 + b_p.size * 2 + M_pad * N * 2
                         + (M_pad * N * 2 if residual is not None else 0))
    cost = pl.CostEstimate(flops=2 * M_pad * K_pad * N,
                           transcendentals=0,
                           bytes_accessed=bytes_accessed)

    out = pl.pallas_call(
        kernel,
        out_shape=jax.ShapeDtypeStruct((M_pad, N), out_dtype),
        grid_spec=pltpu.PrefetchScalarGridSpec(
            num_scalar_prefetch=0,
            grid=(nm, nn, nk),
            in_specs=in_specs,
            out_specs=pl.BlockSpec((tm, tn), lambda i, j, k: (i, j)),
            scratch_shapes=[pltpu.VMEM((tm, tn), jnp.float32)],
        ),
        compiler_params=pltpu.CompilerParams(
            dimension_semantics=("parallel", "parallel", "arbitrary")),
        cost_estimate=cost,
    )(*args)
    return out[:M] if M_pad != M else out


def _im2col(x, kh, kw, stride, pad, pad_value=0.0):
    """x: (B,H,W,C) NHWC -> patches (B*OH*OW, kh*kw*C), tap ordering (kh, kw, C).

    Uses a single lane-contiguous concatenate so the final (M, kh*kw*C) view is a
    free reshape (no extra transpose/copy beyond the patch materialization)."""
    B, H, W, C = x.shape
    if pad > 0:
        x = jnp.pad(x, ((0, 0), (pad, pad), (pad, pad), (0, 0)),
                    constant_values=pad_value)
    OH = (H + 2 * pad - kh) // stride + 1
    OW = (W + 2 * pad - kw) // stride + 1
    cols = [
        x[:, i:i + stride * OH:stride, j:j + stride * OW:stride, :]
        for i in range(kh) for j in range(kw)
    ]
    patches = cols[0] if len(cols) == 1 else jnp.concatenate(cols, axis=-1)
    return patches.reshape(B * OH * OW, kh * kw * C), (B, OH, OW)


def conv_bn(x, w, scale, bias, stride, pad, relu=True, residual=None):
    """Conv2d + folded BatchNorm (+residual) (+ReLU).  x: NHWC bf16, w: (kh,kw,Cin,Cout)."""
    # TODO(synk): fold the kh*kw tap loop into the matmul kernel (shift-and-accumulate
    # over a tap grid axis / halo DMA) to avoid materializing 9x-inflated im2col
    # patches in HBM for the 3x3 layers.
    kh, kw, cin, cout = w.shape
    patches, (B, OH, OW) = _im2col(x, kh, kw, stride, pad)
    w2 = w.reshape(kh * kw * cin, cout)
    res2 = None if residual is None else residual.reshape(B * OH * OW, cout)
    y = matmul_bn_pallas(patches, w2, scale, bias, residual=res2, relu=relu)
    return y.reshape(B, OH, OW, cout)


def maxpool_3x3_s2(x):
    """MaxPool2d(kernel=3, stride=2, padding=1), x: NHWC bf16."""
    B, H, W, C = x.shape
    k, s, pad = 3, 2, 1
    neg = float(jnp.finfo(x.dtype).min)
    xp = jnp.pad(x, ((0, 0), (pad, pad), (pad, pad), (0, 0)), constant_values=neg)
    OH = (H + 2 * pad - k) // s + 1
    OW = (W + 2 * pad - k) // s + 1
    M = B * OH * OW
    cols = [xp[:, i:i + s * OH:s, j:j + s * OW:s, :].reshape(M, C)
            for i in range(k) for j in range(k)]
    patches = jnp.stack(cols, axis=0)                      # (9, M, C): taps lead, lanes = C
    tm = min(256, _round_up(M, 8))
    M_pad = _round_up(M, tm)
    if M_pad != M:
        patches = jnp.pad(patches, ((0, 0), (0, M_pad - M), (0, 0)),
                          constant_values=neg)

    out = pl.pallas_call(
        _maxpool_kernel,
        out_shape=jax.ShapeDtypeStruct((M_pad, C), x.dtype),
        grid=(M_pad // tm,),
        in_specs=[pl.BlockSpec((k * k, tm, C), lambda i: (0, i, 0))],
        out_specs=pl.BlockSpec((tm, C), lambda i: (i, 0)),
        compiler_params=pltpu.CompilerParams(dimension_semantics=("parallel",)),
    )(patches)
    out = out[:M] if M_pad != M else out
    return out.reshape(B, OH, OW, C)


def pool_and_head(x, fc_w, fc_b, alpha_w, alpha_b):
    """Fused AdaptiveAvgPool2d((1,1)) + fc + alpha(sigmoid) attention head."""
    B, H, W, C = x.shape
    nc = fc_w.shape[1]
    x2 = x.reshape(B, H * W, C)

    # Pack [alpha | fc | zeros] into one lane-dense (C, 128) weight so the head
    # is a single matmul and a single unmasked 128-lane store.
    HEADW = 128
    w_head = jnp.zeros((C, HEADW), jnp.float32)
    w_head = w_head.at[:, 0:1].set(alpha_w.astype(jnp.float32))
    w_head = w_head.at[:, 1:1 + nc].set(fc_w.astype(jnp.float32))
    b_head = jnp.zeros((1, HEADW), jnp.float32)
    b_head = b_head.at[0, 0].set(alpha_b.astype(jnp.float32)[0])
    b_head = b_head.at[0, 1:1 + nc].set(fc_b.astype(jnp.float32))

    kernel = functools.partial(_pool_head_kernel, inv_hw=1.0 / float(H * W))
    packed = pl.pallas_call(
        kernel,
        out_shape=jax.ShapeDtypeStruct((B, HEADW), jnp.float32),
        in_specs=[_VMEM, _VMEM, _VMEM],
        out_specs=_VMEM,
    )(x2, w_head, b_head)
    return packed[:, 0:1], packed[:, 1:1 + nc]


# ----------------------------------------------------------------------------
# Deterministic parameter construction (synthetic ResNet-18 weights)
# ----------------------------------------------------------------------------

def _conv_bn_params(key, kh, kw, cin, cout):
    k1, k2, k3, k4, k5 = jax.random.split(key, 5)
    w = jax.random.normal(k1, (kh, kw, cin, cout), jnp.float32) / math.sqrt(kh * kw * cin)
    gamma = 1.0 + 0.1 * jax.random.normal(k2, (cout,), jnp.float32)
    beta = 0.1 * jax.random.normal(k3, (cout,), jnp.float32)
    mean = 0.1 * jax.random.normal(k4, (cout,), jnp.float32)
    var = 0.5 + 0.1 * jnp.abs(jax.random.normal(k5, (cout,), jnp.float32))
    scale = gamma / jnp.sqrt(var + 1e-5)          # eval-mode BN folded into affine
    bias = beta - mean * scale
    return {"w": w, "scale": scale, "bias": bias}


def init_params(key, num_classes=7):
    keys = iter(jax.random.split(key, 64))
    params = {"conv1": _conv_bn_params(next(keys), 7, 7, 3, 64)}
    in_c = 64
    for li, out_c in enumerate([64, 128, 256, 512]):
        blocks = []
        for bi in range(2):
            stride = 2 if (li > 0 and bi == 0) else 1
            blk = {
                "conv1": _conv_bn_params(next(keys), 3, 3, in_c, out_c),
                "conv2": _conv_bn_params(next(keys), 3, 3, out_c, out_c),
                "stride": stride,
            }
            if stride != 1 or in_c != out_c:
                blk["down"] = _conv_bn_params(next(keys), 1, 1, in_c, out_c)
            blocks.append(blk)
            in_c = out_c
        params[f"layer{li + 1}"] = blocks
    kf1, kf2, ka1, ka2 = jax.random.split(next(keys), 4)
    params["fc_w"] = jax.random.normal(kf1, (512, num_classes), jnp.float32) / math.sqrt(512)
    params["fc_b"] = 0.01 * jax.random.normal(kf2, (num_classes,), jnp.float32)
    params["alpha_w"] = jax.random.normal(ka1, (512, 1), jnp.float32) / math.sqrt(512)
    params["alpha_b"] = 0.01 * jax.random.normal(ka2, (1,), jnp.float32)
    return params


# ----------------------------------------------------------------------------
# Res18Feature.forward
# ----------------------------------------------------------------------------

def res18_feature_forward(params, x_nchw, drop_rate=0.0):
    # TODO(synk): drop_rate > 0 (nn.Dropout) not implemented; module default is 0.
    x = jnp.transpose(x_nchw, (0, 2, 3, 1)).astype(jnp.bfloat16)   # NCHW -> NHWC, bf16

    p = params["conv1"]
    x = conv_bn(x, p["w"], p["scale"], p["bias"], stride=2, pad=3, relu=True)
    x = maxpool_3x3_s2(x)

    for li in range(4):
        for blk in params[f"layer{li + 1}"]:
            stride = blk["stride"]
            identity = x
            y = conv_bn(x, blk["conv1"]["w"], blk["conv1"]["scale"], blk["conv1"]["bias"],
                        stride=stride, pad=1, relu=True)
            if "down" in blk:
                identity = conv_bn(x, blk["down"]["w"], blk["down"]["scale"],
                                   blk["down"]["bias"], stride=stride, pad=0, relu=False)
            x = conv_bn(y, blk["conv2"]["w"], blk["conv2"]["scale"], blk["conv2"]["bias"],
                        stride=1, pad=1, relu=True, residual=identity)

    # Fused global avgpool + fc + alpha(sigmoid) head.
    attention_weights, out = pool_and_head(x, params["fc_w"], params["fc_b"],
                                           params["alpha_w"], params["alpha_b"])
    return attention_weights, out


# ----------------------------------------------------------------------------
# Main
# ----------------------------------------------------------------------------

if __name__ == "__main__":
    key = jax.random.PRNGKey(0)
    pkey, xkey = jax.random.split(key)
    params = init_params(pkey, num_classes=7)

    # Small NCHW input (PyTorch convention): batch=2, 3 channels, 32x32 spatial
    # (smallest spatial size that survives the 5 downsamplings of ResNet-18).
    x = jax.random.normal(xkey, (2, 3, 32, 32), jnp.float32)

    attention_weights, out = res18_feature_forward(params, x)
    jax.block_until_ready((attention_weights, out))

    assert attention_weights.shape == (2, 1)
    assert out.shape == (2, 7)
    assert bool(jnp.all(jnp.isfinite(attention_weights))) and bool(jnp.all(jnp.isfinite(out)))
    print("KERNEL_OK")
</pallas_src>

<mosaic_0001>
module attributes {stable_mosaic.version = 11 : i64} {
  func.func @_matmul_bn_kernel(%arg0: i32, %arg1: i32, %arg2: i32, %arg3: memref<256x256xbf16, #tpu.memory_space<vmem>>, %arg4: memref<256x64xbf16, #tpu.memory_space<vmem>>, %arg5: memref<1x64xf32, #tpu.memory_space<vmem>>, %arg6: memref<1x64xf32, #tpu.memory_space<vmem>>, %arg7: memref<256x64xbf16, #tpu.memory_space<vmem>>, %arg8: memref<256x64xf32, #tpu.memory_space<vmem>>) attributes {dimension_semantics = [#tpu.dimension_semantics<parallel>, #tpu.dimension_semantics<parallel>, #tpu.dimension_semantics<arbitrary>], iteration_bounds = array<i64: 2, 1, 1>, scalar_prefetch = 0 : i64, scratch_operands = 1 : i64, tpu.core_type = #tpu.core_type<tc>, window_params = [{transform_indices = @transform_0, window_bounds = array<i64: 256, 256>}, {transform_indices = @transform_1, window_bounds = array<i64: 256, 64>}, {transform_indices = @transform_2, window_bounds = array<i64: 1, 64>}, {transform_indices = @transform_3, window_bounds = array<i64: 1, 64>}, {transform_indices = @transform_4, window_bounds = array<i64: 256, 64>}]} {
    %c0_i32 = arith.constant 0 : i32
    %0 = arith.cmpi eq, %arg2, %c0_i32 : i32
    %1 = arith.extui %0 : i1 to i32
    %c0_i32_0 = arith.constant 0 : i32
    %2 = arith.cmpi ne, %1, %c0_i32_0 : i32
    scf.if %2 {
      %cst_10 = arith.constant 0.000000e+00 : f32
      %12 = vector.broadcast %cst_10 : f32 to vector<256x64xf32>
      %c0_11 = arith.constant 0 : index
      %c0_12 = arith.constant 0 : index
      %13 = vector.load %arg8[%c0_11, %c0_12] : memref<256x64xf32, #tpu.memory_space<vmem>>, vector<256x64xf32>
      tpu.vector_store %arg8[%c0_11, %c0_12], %12 {strides = array<i32>} : memref<256x64xf32, #tpu.memory_space<vmem>>, vector<256x64xf32>,
    } else {
    }
    %c0 = arith.constant 0 : index
    %c0_1 = arith.constant 0 : index
    %3 = vector.load %arg8[%c0, %c0_1] : memref<256x64xf32, #tpu.memory_space<vmem>>, vector<256x64xf32>
    %c0_2 = arith.constant 0 : index
    %c0_3 = arith.constant 0 : index
    %4 = vector.load %arg3[%c0_2, %c0_3] : memref<256x256xbf16, #tpu.memory_space<vmem>>, vector<256x256xbf16>
    %c0_4 = arith.constant 0 : index
    %c0_5 = arith.constant 0 : index
    %5 = vector.load %arg4[%c0_4, %c0_5] : memref<256x64xbf16, #tpu.memory_space<vmem>>, vector<256x64xbf16>
    %cst = arith.constant dense<0.000000e+00> : vector<256x64xf32>
    %6 = tpu.matmul %4, %5, %cst {dimension_numbers = #tpu.dot_dimension_numbers<[1], [0], [0], [1], [0, 0, 1, 1], [], []>} : vector<256x256xbf16>, vector<256x64xbf16>, vector<256x64xf32> -> vector<256x64xf32>
    %7 = arith.addf %3, %6 : vector<256x64xf32>
    %c0_6 = arith.constant 0 : index
    %c0_7 = arith.constant 0 : index
    %8 = vector.load %arg8[%c0_6, %c0_7] : memref<256x64xf32, #tpu.memory_space<vmem>>, vector<256x64xf32>
    tpu.vector_store %arg8[%c0_6, %c0_7], %7 {strides = array<i32>} : memref<256x64xf32, #tpu.memory_space<vmem>>, vector<256x64xf32>,
    %c0_i32_8 = arith.constant 0 : i32
    %9 = arith.cmpi eq, %arg2, %c0_i32_8 : i32
    %10 = arith.extui %9 : i1 to i32
    %c0_i32_9 = arith.constant 0 : i32
    %11 = arith.cmpi ne, %10, %c0_i32_9 : i32
    scf.if %11 {
      %c0_10 = arith.constant 0 : index
      %c0_11 = arith.constant 0 : index
      %12 = vector.load %arg8[%c0_10, %c0_11] : memref<256x64xf32, #tpu.memory_space<vmem>>, vector<256x64xf32>
      %c0_12 = arith.constant 0 : index
      %c0_13 = arith.constant 0 : index
      %13 = vector.load %arg5[%c0_12, %c0_13] : memref<1x64xf32, #tpu.memory_space<vmem>>, vector<1x64xf32>
      %14 = vector.broadcast %13 : vector<1x64xf32> to vector<256x64xf32>
      %15 = arith.mulf %12, %14 : vector<256x64xf32>
      %c0_14 = arith.constant 0 : index
      %c0_15 = arith.constant 0 : index
      %16 = vector.load %arg6[%c0_14, %c0_15] : memref<1x64xf32, #tpu.memory_space<vmem>>, vector<1x64xf32>
      %17 = vector.broadcast %16 : vector<1x64xf32> to vector<256x64xf32>
      %18 = arith.addf %15, %17 : vector<256x64xf32>
      %cst_16 = arith.constant 0.000000e+00 : f32
      %19 = vector.broadcast %cst_16 : f32 to vector<256x64xf32>
      %20 = arith.maximumf %18, %19 : vector<256x64xf32>
      %21 = arith.truncf %20 : vector<256x64xf32> to vector<256x64xbf16>
      %c0_17 = arith.constant 0 : index
      %c0_18 = arith.constant 0 : index
      %22 = vector.load %arg7[%c0_17, %c0_18] : memref<256x64xbf16, #tpu.memory_space<vmem>>, vector<256x64xbf16>
      tpu.vector_store %arg7[%c0_17, %c0_18], %21 {strides = array<i32>} : memref<256x64xbf16, #tpu.memory_space<vmem>>, vector<256x64xbf16>,
    } else {
    }
    return
  }
  func.func @transform_0(%arg0: i32, %arg1: i32, %arg2: i32) -> (i32, i32) {
    %c0_i32 = arith.constant 0 : i32
    return %arg0, %arg2 : i32, i32
  }
  func.func @transform_1(%arg0: i32, %arg1: i32, %arg2: i32) -> (i32, i32) {
    %c0_i32 = arith.constant 0 : i32
    return %arg2, %arg1 : i32, i32
  }
  func.func @transform_2(%arg0: i32, %arg1: i32, %arg2: i32) -> (i32, i32) {
    %c0_i32 = arith.constant 0 : i32
    %c0_i32_0 = arith.constant 0 : i32
    return %c0_i32, %arg1 : i32, i32
  }
  func.func @transform_3(%arg0: i32, %arg1: i32, %arg2: i32) -> (i32, i32) {
    %c0_i32 = arith.constant 0 : i32
    %c0_i32_0 = arith.constant 0 : i32
    return %c0_i32, %arg1 : i32, i32
  }
  func.func @transform_4(%arg0: i32, %arg1: i32, %arg2: i32) -> (i32, i32) {
    %c0_i32 = arith.constant 0 : i32
    return %arg0, %arg1 : i32, i32
  }
}

</mosaic_0001>

<bundles_post_ra>
// kernel: tpu_custom_call.1
= control target key start
LH: loop header
LB: loop body
LE: loop exit
PB: predicated region body
PF: predicated region fallthrough
CT: control target
= control target key end

     0   :  { %9 = vsyncpa [#allocation4], 0  ;;  %s2282_s0 = inlined_call_operand.hbm [shape: bf16[512,256], index: 0, kind: input, shape index: {}]   ;;  %s2283_s1 = inlined_call_operand.vmem [shape: bf16[256,64], index: 1, kind: input, shape index: {}]   ;;  %s2284_s2 = inlined_call_operand.vmem [shape: f32[1,64], index: 2, kind: input, shape index: {}]   ;;  %s2285_s3 = inlined_call_operand.vmem [shape: f32[1,64], index: 3, kind: input, shape index: {}]   ;;  %s2286_s4 = inlined_call_operand.vmem [shape: bf16[512,64], index: 4, kind: output, shape index: {}]  }
   0x1   :  { %11 = vsyncpa [#allocation4 + $0x1], 0  ;;  %s1864_s15 = smov 0   ;;  %s1866_s16 = smov 0  }
   0x2   :  { %s1868_s17 = smov 0   ;;  %s1870_s18 = smov 0  }
   0x3   :  { %s1872_s19 = smov 0   ;;  %s1874_s20 = smov 0  }
   0x4 LB: > { %s1370_s21 = sadd.s32 4294967295, %s1833_s20   ;;  %s36_s22 = sadd.s32 1, %s1829_s19  ;;  %s1833_s20 = sphi %s1874_s20, %s17_s20   ;;  %s1829_s19 = sphi %s1872_s19, %s2295_s19   ;;  %s1825_s18 = sphi %s1870_s18, %s2294_s18   ;;  %s1821_s17 = sphi %s1868_s17, %s2293_s17   ;;  %s1817_s16 = sphi %s1866_s16, %s2292_s16   ;;  %s1813_s15 = sphi %s1864_s15, %s2291_s15  }
   0x5   : > { %p38_p0 = scmp.ge.s32.totalorder %s36_s22, 2  ;;  %s45_s23 = sadd.s32 1, %s1821_s17 }
   0x6   : > { %p52_p1 = scmp.ne.s32.totalorder %s1821_s17, %s1817_s16  ;;  %p53_p2 = scmp.eq.s32.totalorder %s1833_s20, 0 }
   0x7   : > { %s2297_s22 = smov (%p38_p0, %s36_s22), 0  ;;  %p58_p4 = scmp.ne.s32.totalorder %s1817_s16, %s1813_s15 }
   0x8   : > { %p1900_p3 = por %p53_p2, %p52_p1  ;;  %s40_s25 = ssub.s32 %s1829_s19, %s2297_s22 }
   0x9   : > { %p59_p5 = scmp.eq.s32.totalorder %s1370_s21, 0  ;;  %p43_p6 = scmp.eq.s32.totalorder %s40_s25, 0 }
   0xa   : > { %p1637_p8 = scmp.lt.s32.totalorder %s1833_s20, 2  ;;  %s214_s28 = sand.u32 1, %s1821_s17  }
   0xb   : > { %p1907_p7 = por %p59_p5, %p58_p4  ;;  %s1470_s29 = sshll.u32 %s1829_s19, 12 }
   0xc   : > { %s1913_s27 = scalar_select %p43_p6, %s1821_s17, %s45_s23  }
   0xd   : > { %s1377_s30 = sshll.u32 %s214_s28, 8  ;;  %s1920_s7 = scalar_lea.hbm %s2282_s0, %s1470_s29 }
   0xe   : > { %s218_s8 = scalar_lea.vmem [#allocation3], %s1377_s30  ;;  %p1924_p9 = pnand %p1637_p8, %p1900_p3 }
   0xf   : > { %s228_s9 = sshll.u32 %s218_s8, 4  ;;  %s1930_s11 = scalar_lea.sflag [#allocation4], %s214_s28  ;;  %s1928_s9 = int_to_ptr.vmem [resolvable:$true] %s228_s9 }
  0x10   : > { %s1753_s12 = scalar_lea.hbm %s1920_s7, 4096  ;;  %p1755_p11 = pneg %p1924_p9 }
  0x11   : > { %p1754_p10 = scmp.ne.s32.totalorder %s1920_s7, %s1753_s12  ;;  %s1758_s15 = scalar_lea.hbm %s2282_s0, 8192 }
  0x12   : > { %p1759_p0 = scmp.lt.u32.totalorder %s1920_s7, %s2282_s0  ;;  %p1760_p1 = scmp.lt.u32.totalorder %s1758_s15, %s1753_s12 }
  0x13   : > { %p1756_p12 = pnand %p1755_p11, %p1754_p10  ;;  %p1762_p3 = scmp.lt.u32.totalorder %s1753_s12, %s1920_s7 }
  0x14   : > { %p1761_p2 = por %p1760_p1, %p1759_p0 }
  0x15   : > { %p1757_p13 = pneg %p1756_p12 }
  0x16   : > { %p1763_p4 = por %p1762_p3, %p1761_p2 }
  0x18   : > { %p1764_p5 = pnand %p1763_p4, %p1757_p13 }
  0x1a   : > { %1767 = shalt.err (!%p1764_p5)
}
  0x1b   : > { %s1768_s24 = scalar_lea.vmem %s1928_s9, 4096  ;;  %s1835_s25 = smov [#allocation3]  }
  0x1c   : > { %p1769_p6 = scmp.ne.s32.totalorder %s1928_s9, %s1768_s24  ;;  %s1773_s28 = sshll.u32 %s1835_s25, 4  ;;  %s1774_s28 = int_to_ptr.vmem [resolvable:$false] %s1773_s28 }
  0x1d   : > { %s1775_s29 = scalar_lea.vmem %s1774_s28, 8192  ;;  %p1776_p12 = scmp.lt.s32.totalorder %s1928_s9, %s1774_s28 }
  0x1e   : > { %p1771_p8 = pnand %p1769_p6, %p1755_p11  ;;  %p1777_p0 = scmp.lt.s32.totalorder %s1775_s29, %s1768_s24 }
  0x20   : > { %p1772_p10 = pneg %p1771_p8  ;;  %p1778_p1 = por %p1777_p0, %p1776_p12 }
  0x22   : > { %p1779_p2 = pnand %p1778_p1, %p1772_p10 }
  0x24   : > { %1782 = shalt.err (!%p1779_p2)
}
  0x25   : > { %s1836_s30 = smov 128   ;;  %s1837_s5 = smov 8  }
  0x26   : > { %1636 = dma.hbm_to_vmem [thread:$0]  (!%p1924_p9), %s1920_s7, 4096, %s1928_s9, %s1930_s11, %s1836_s30, %s1836_s30, %s1837_s5  }
  0x27   : > { %p1381_p11 = scmp.ge.s32.totalorder %s1833_s20, 1  ;;  %p236_p13 = scmp.lt.s32.totalorder %s1833_s20, 3 }
  0x29   : > { %p237_p3 = pnand %p1381_p11, %p236_p13 }
  0x2a   : > { %s242_s6 = sand.u32 (!%p237_p3), 1, %s1817_s16  }
  0x2b   : > { %240 = sbr.rel (%p237_p3) target bundleno = 378 (0x17a), region = 36  ;;  %s1382_s8 = sshll.u32 (!%p237_p3), %s242_s6, 8 }
  0x2c   : > { %s243_s12 = scalar_lea.sflag (!%p237_p3), [#allocation4], %s242_s6  ;;  %s1961_s13 = scalar_lea.vmem (!%p237_p3), [#allocation3], %s1382_s8 }
  0x32   : > { %1808 = dma.done.wait (%p1907_p7), %s243_s12, 4096  }
  0x33   : > { %1810 = vsyncadd (%p1907_p7), %s243_s12, 4294963200  ;;  %v1689_v0 = vld [vmem:[%s2283_s1 + $0x40] sm:$0xff]   ;;  %v1691_v2 = vld [vmem:[%s2283_s1 + $0x48] sm:$0xff]   ;;  %vm319_vm0 = vcmask 523264   ;;  %v1838_v48 = vmov 0.0   ;;  %vm1203_vm1 = vcmask 519168  }
  0x34   : > { %v1690_v1 = vld [vmem:[%s2283_s1] sm:$0xff]   ;;  %1503 = vmatprep.subr.bf16.mxu0 %v1689_v0  ;;  %1615 = vmatprep.subr.bf16.mxu1 %v1689_v0  ;;  %v1692_v3 = vld [vmem:[%s2283_s1 + $0x8] sm:$0xff]   ;;  %v1693_v4 = vld [vmem:[%s2283_s1 + $0x50] sm:$0xff]   ;;  %320 = vst.msk [vmem:[#allocation2] sm:$0xff] %vm319_vm0, %v1838_v48 }
  0x35   : > { %1504 = vmatpush3.bf16.msra.mxu0 %v1690_v1  ;;  %1623 = vmatpush3.bf16.msra.mxu1 %v1690_v1  ;;  %v1694_v5 = vld [vmem:[%s2283_s1 + $0x10] sm:$0xff]   ;;  %v1695_v6 = vld [vmem:[%s2283_s1 + $0x58] sm:$0xff]   ;;  %v1697_v8 = vld [vmem:[%s2283_s1 + $0x60] sm:$0xff]   ;;  %321 = vst.msk [vmem:[#allocation2 + $0x8] sm:$0xff] %vm319_vm0, %v1838_v48 }
  0x36   : > { %1505 = vmatprep.subr.bf16.mxu0 %v1691_v2  ;;  %1616 = vmatprep.subr.bf16.mxu1 %v1691_v2  ;;  %v1696_v7 = vld [vmem:[%s2283_s1 + $0x18] sm:$0xff]   ;;  %v1698_v9 = vld [vmem:[%s2283_s1 + $0x20] sm:$0xff]   ;;  %v1699_v10 = vld [vmem:[%s2283_s1 + $0x68] sm:$0xff]   ;;  %322 = vst.msk [vmem:[#allocation2 + $0x10] sm:$0xff] %vm319_vm0, %v1838_v48 }
  0x37   : > { %v1707_v11 = vld [vmem:[%s1961_s13 + $0x4] ss:$8 sps:$4 sm:$0xff]   ;;  %v1701_v14 = vld [vmem:[%s2283_s1 + $0x70] sm:$0xff]   ;;  %v1703_v16 = vld [vmem:[%s2283_s1 + $0x78] sm:$0xff]   ;;  %323 = vst.msk [vmem:[#allocation2 + $0x18] sm:$0xff] %vm319_vm0, %v1838_v48 }
  0x38   : > { %v1710_v12 = vld [vmem:[%s1961_s13 + $0x84] ss:$8 sps:$4 sm:$0xff]   ;;  %736 = vmatprep.mubr.bf16.mxu0 %v1707_v11  ;;  %v1702_v15 = vld [vmem:[%s2283_s1 + $0x30] sm:$0xff]   ;;  %v1704_v17 = vld [vmem:[%s2283_s1 + $0x38] sm:$0xff]   ;;  %324 = vst.msk [vmem:[#allocation2 + $0x20] sm:$0xff] %vm319_vm0, %v1838_v48 }
  0x39   : > { %1506 = vmatpush3.bf16.msra.mxu0 %v1692_v3  ;;  %1624 = vmatpush3.bf16.msra.mxu1 %v1692_v3  ;;  %v1700_v13 = vld [vmem:[%s2283_s1 + $0x28] sm:$0xff]   ;;  %v1711_v20 = vld [vmem:[%s1961_s13 + $0x14] ss:$8 sps:$4 sm:$0xff]   ;;  %v1715_v22 = vld [vmem:[%s1961_s13 + $0x10] ss:$8 sps:$4 sm:$0xff]   ;;  %325 = vst.msk [vmem:[#allocation2 + $0x28] sm:$0xff] %vm319_vm0, %v1838_v48 }
  0x3a   : > { %1507 = vmatprep.subr.bf16.mxu0 %v1693_v4  ;;  %1617 = vmatprep.subr.bf16.mxu1 %v1693_v4  ;;  %v1705_v18 = vld [vmem:[%s1961_s13] ss:$8 sps:$4 sm:$0xff]   ;;  %v1713_v21 = vld [vmem:[%s1961_s13 + $0x94] ss:$8 sps:$4 sm:$0xff]   ;;  %v1716_v23 = vld [vmem:[%s1961_s13 + $0x90] ss:$8 sps:$4 sm:$0xff]  }
  0x3b   : > { %800 = vmatprep.mubr.bf16.mxu1 %v1710_v12  ;;  %v1708_v19 = vld [vmem:[%s1961_s13 + $0x80] ss:$8 sps:$4 sm:$0xff]   ;;  %v1717_v24 = vld [vmem:[%s1961_s13 + $0x24] ss:$8 sps:$4 sm:$0xff]   ;;  %v1723_v28 = vld [vmem:[%s1961_s13 + $0x34] ss:$8 sps:$4 sm:$0xff]  }
  0x3c   : > { %v1719_v25 = vld [vmem:[%s1961_s13 + $0xa4] ss:$8 sps:$4 sm:$0xff]   ;;  %v1721_v26 = vld [vmem:[%s1961_s13 + $0x20] ss:$8 sps:$4 sm:$0xff]   ;;  %v1725_v29 = vld [vmem:[%s1961_s13 + $0xb4] ss:$8 sps:$4 sm:$0xff]  }
  0x3d   : > { %1508 = vmatpush3.bf16.msra.mxu0 %v1694_v5  ;;  %1625 = vmatpush3.bf16.msra.mxu1 %v1694_v5  ;;  %v1722_v27 = vld [vmem:[%s1961_s13 + $0xa0] ss:$8 sps:$4 sm:$0xff]   ;;  %v1727_v30 = vld [vmem:[%s1961_s13 + $0x30] ss:$8 sps:$4 sm:$0xff]   ;;  %v1729_v32 = vld [vmem:[%s1961_s13 + $0x44] ss:$8 sps:$4 sm:$0xff]  }
  0x3e   : > { %1509 = vmatprep.subr.bf16.mxu0 %v1695_v6  ;;  %1618 = vmatprep.subr.bf16.mxu1 %v1695_v6  ;;  %v1728_v31 = vld [vmem:[%s1961_s13 + $0xb0] ss:$8 sps:$4 sm:$0xff]   ;;  %v1731_v33 = vld [vmem:[%s1961_s13 + $0xc4] ss:$8 sps:$4 sm:$0xff]   ;;  %v1733_v34 = vld [vmem:[%s1961_s13 + $0x40] ss:$8 sps:$4 sm:$0xff]  }
  0x3f   : > { %v1734_v35 = vld [vmem:[%s1961_s13 + $0xc0] ss:$8 sps:$4 sm:$0xff]   ;;  %v1735_v36 = vld [vmem:[%s1961_s13 + $0x54] ss:$8 sps:$4 sm:$0xff]   ;;  %v1739_v38 = vld [vmem:[%s1961_s13 + $0x50] ss:$8 sps:$4 sm:$0xff]  }
  0x40   : > { %v1737_v37 = vld [vmem:[%s1961_s13 + $0xd4] ss:$8 sps:$4 sm:$0xff]   ;;  %v1740_v39 = vld [vmem:[%s1961_s13 + $0xd0] ss:$8 sps:$4 sm:$0xff]   ;;  %v1741_v40 = vld [vmem:[%s1961_s13 + $0x64] ss:$8 sps:$4 sm:$0xff]  }
  0x41   : > { %1510 = vmatpush3.bf16.msra.mxu0 %v1696_v7  ;;  %1626 = vmatpush3.bf16.msra.mxu1 %v1696_v7  ;;  %v1743_v41 = vld [vmem:[%s1961_s13 + $0xe4] ss:$8 sps:$4 sm:$0xff]   ;;  %v1745_v42 = vld [vmem:[%s1961_s13 + $0x60] ss:$8 sps:$4 sm:$0xff]   ;;  %v1747_v44 = vld [vmem:[%s1961_s13 + $0x74] ss:$8 sps:$4 sm:$0xff]  }
  0x42   : > { %1511 = vmatprep.subr.bf16.mxu0 %v1697_v8  ;;  %1619 = vmatprep.subr.bf16.mxu1 %v1697_v8  ;;  %v1746_v43 = vld [vmem:[%s1961_s13 + $0xe0] ss:$8 sps:$4 sm:$0xff]   ;;  %v1749_v45 = vld [vmem:[%s1961_s13 + $0xf4] ss:$8 sps:$4 sm:$0xff]   ;;  %v1751_v46 = vld [vmem:[%s1961_s13 + $0x70] ss:$8 sps:$4 sm:$0xff]  }
  0x43   : > { %v1752_v47 = vld [vmem:[%s1961_s13 + $0xf0] ss:$8 sps:$4 sm:$0xff]   ;;  %326 = vst.msk [vmem:[#allocation2 + $0x30] sm:$0xff] %vm319_vm0, %v1838_v48  ;;  %327 = vst.msk [vmem:[#allocation2 + $0x38] sm:$0xff] %vm319_vm0, %v1838_v48  ;;  %v352_v51 = vld [vmem:[#allocation2] sm:$0xff]  ;;  %s1383_s13 = sshll.u32 %s1825_s18, 5 }
  0x44   : > { %328 = vst.msk [vmem:[#allocation2 + $0x40] sm:$0xff] %vm319_vm0, %v1838_v48  ;;  %329 = vst.msk [vmem:[#allocation2 + $0x48] sm:$0xff] %vm319_vm0, %v1838_v48  ;;  %v353_v59 = vld [vmem:[#allocation2 + $0x8] sm:$0xff]  ;;  %p2082_p7 = scmp.lt.s32.totalorder %s1383_s13, 63  ;;  %v354_v7 = vld [vmem:[#allocation2 + $0x10] sm:$0xff] }
  0x45   : > { %1512 = vmatpush3.bf16.msra.mxu0 %v1698_v9  ;;  %1627 = vmatpush3.bf16.msra.mxu1 %v1698_v9  ;;  %330 = vst.msk [vmem:[#allocation2 + $0x50] sm:$0xff] %vm319_vm0, %v1838_v48  ;;  %331 = vst.msk [vmem:[#allocation2 + $0x58] sm:$0xff] %vm319_vm0, %v1838_v48 }
  0x46   : > { %1513 = vmatprep.subr.bf16.mxu0 %v1699_v10  ;;  %1620 = vmatprep.subr.bf16.mxu1 %v1699_v10  ;;  %332 = vst.msk [vmem:[#allocation2 + $0x60] sm:$0xff] %vm319_vm0, %v1838_v48  ;;  %333 = vst.msk [vmem:[#allocation2 + $0x68] sm:$0xff] %vm319_vm0, %v1838_v48  ;;  %s2299_s13 = smov (!%p2082_p7, %s1383_s13), 63 }
  0x47   : > { %334 = vst.msk [vmem:[#allocation2 + $0x70] sm:$0xff] %vm319_vm0, %v1838_v48  ;;  %335 = vst.msk [vmem:[#allocation2 + $0x78] sm:$0xff] %vm319_vm0, %v1838_v48  ;;  %s1384_s14 = sshll.u32 %s2299_s13, 2 }
  0x48   : > { %336 = vst.msk [vmem:[#allocation2 + $0x80] sm:$0xff] %vm319_vm0, %v1838_v48  ;;  %337 = vst.msk [vmem:[#allocation2 + $0x88] sm:$0xff] %vm319_vm0, %v1838_v48  ;;  %s2118_s9 = scalar_lea.vmem %s2286_s4, %s1384_s14 }
  0x49   : > { %1514 = vmatpush3.bf16.msra.mxu0 %v1700_v13  ;;  %1628 = vmatpush3.bf16.msra.mxu1 %v1700_v13  ;;  %338 = vst.msk [vmem:[#allocation2 + $0x90] sm:$0xff] %vm319_vm0, %v1838_v48  ;;  %339 = vst.msk [vmem:[#allocation2 + $0x98] sm:$0xff] %vm319_vm0, %v1838_v48 }
  0x4a   : > { %1515 = vmatprep.subr.bf16.mxu0 %v1701_v14  ;;  %1621 = vmatprep.subr.bf16.mxu1 %v1701_v14  ;;  %340 = vst.msk [vmem:[#allocation2 + $0xa0] sm:$0xff] %vm319_vm0, %v1838_v48  ;;  %341 = vst.msk [vmem:[#allocation2 + $0xa8] sm:$0xff] %vm319_vm0, %v1838_v48 }
  0x4b   : > { %342 = vst.msk [vmem:[#allocation2 + $0xb0] sm:$0xff] %vm319_vm0, %v1838_v48  ;;  %343 = vst.msk [vmem:[#allocation2 + $0xb8] sm:$0xff] %vm319_vm0, %v1838_v48 }
  0x4c   : > { %344 = vst.msk [vmem:[#allocation2 + $0xc0] sm:$0xff] %vm319_vm0, %v1838_v48  ;;  %345 = vst.msk [vmem:[#allocation2 + $0xc8] sm:$0xff] %vm319_vm0, %v1838_v48 }
  0x4d   : > { %1516 = vmatpush3.bf16.msra.mxu0 %v1702_v15  ;;  %1629 = vmatpush3.bf16.msra.mxu1 %v1702_v15  ;;  %346 = vst.msk [vmem:[#allocation2 + $0xd0] sm:$0xff] %vm319_vm0, %v1838_v48  ;;  %347 = vst.msk [vmem:[#allocation2 + $0xd8] sm:$0xff] %vm319_vm0, %v1838_v48  ;;  %v2091_v15 = vld [vmem:[%s2284_s2] ss:$0 sm:$0xff] }
  0x4e   : > { %1517 = vmatprep.subr.bf16.mxu0 %v1703_v16  ;;  %1622 = vmatprep.subr.bf16.mxu1 %v1703_v16  ;;  %348 = vst.msk [vmem:[#allocation2 + $0xe0] sm:$0xff] %vm319_vm0, %v1838_v48  ;;  %349 = vst.msk [vmem:[#allocation2 + $0xe8] sm:$0xff] %vm319_vm0, %v1838_v48  ;;  %v355_v16 = vld [vmem:[#allocation2 + $0x18] sm:$0xff] }
  0x4f   : > { %350 = vst.msk [vmem:[#allocation2 + $0xf0] sm:$0xff] %vm319_vm0, %v1838_v48  ;;  %351 = vst.msk [vmem:[#allocation2 + $0xf8] sm:$0xff] %vm319_vm0, %v1838_v48  ;;  %v368_v53 = vld [vmem:[#allocation2 + $0x80] sm:$0xff]  ;;  %v369_v61 = vld [vmem:[#allocation2 + $0x88] sm:$0xff] }
  0x50   : > { %v370_v9 = vld [vmem:[#allocation2 + $0x90] sm:$0xff] }
  0x51   : > { %1518 = vmatpush3.bf16.msra.mxu0 %v1704_v17  ;;  %1630 = vmatpush3.bf16.msra.mxu1 %v1704_v17 }
  0x54   : > { %737 = vmatmul.mubr.bf16.vlgmr.msra.gmra.mrb[0].mxu0 %v1705_v18  ;;  %801 = vmatmul.mubr.bf16.vlgmr.msra.gmra.mrb[0].mxu1 %v1708_v19  ;;  %v371_v18 = vld [vmem:[#allocation2 + $0x98] sm:$0xff] }
  0x55   : > { %744 = vmatprep.mubr.bf16.mxu0 %v1711_v20  ;;  %808 = vmatprep.mubr.bf16.mxu1 %v1713_v21 }
  0x5c   : > { %745 = vmatmul.mubr.bf16.gmra.mrb[4].mxu0 %v1715_v22  ;;  %809 = vmatmul.mubr.bf16.gmra.mrb[4].mxu1 %v1716_v23 }
  0x5d   : > { %752 = vmatprep.mubr.bf16.mxu0 %v1717_v24  ;;  %816 = vmatprep.mubr.bf16.mxu1 %v1719_v25  ;;  %v2100_v25 = vld [vmem:[%s2285_s3] ss:$0 sm:$0xff] }
  0x64   : > { %753 = vmatmul.mubr.bf16.gmra.mrb[8].mxu0 %v1721_v26  ;;  %817 = vmatmul.mubr.bf16.gmra.mrb[8].mxu1 %v1722_v27 }
  0x65   : > { %760 = vmatprep.mubr.bf16.mxu0 %v1723_v28  ;;  %824 = vmatprep.mubr.bf16.mxu1 %v1725_v29 }
  0x6c   : > { %761 = vmatmul.mubr.bf16.gmra.mrb[12].mxu0 %v1727_v30  ;;  %825 = vmatmul.mubr.bf16.gmra.mrb[12].mxu1 %v1728_v31 }
  0x6d   : > { %768 = vmatprep.mubr.bf16.mxu0 %v1729_v32  ;;  %832 = vmatprep.mubr.bf16.mxu1 %v1731_v33 }
  0x74   : > { %769 = vmatmul.mubr.bf16.gmra.mrb[16].mxu0 %v1733_v34  ;;  %833 = vmatmul.mubr.bf16.gmra.mrb[16].mxu1 %v1734_v35 }
  0x75   : > { %776 = vmatprep.mubr.bf16.mxu0 %v1735_v36  ;;  %840 = vmatprep.mubr.bf16.mxu1 %v1737_v37 }
  0x7c   : > { %777 = vmatmul.mubr.bf16.gmra.mrb[20].mxu0 %v1739_v38  ;;  %841 = vmatmul.mubr.bf16.gmra.mrb[20].mxu1 %v1740_v39 }
  0x7d   : > { %784 = vmatprep.mubr.bf16.mxu0 %v1741_v40  ;;  %848 = vmatprep.mubr.bf16.mxu1 %v1743_v41 }
  0x84   : > { %785 = vmatmul.mubr.bf16.gmra.mrb[24].mxu0 %v1745_v42  ;;  %849 = vmatmul.mubr.bf16.gmra.mrb[24].mxu1 %v1746_v43 }
  0x85   : > { %792 = vmatprep.mubr.bf16.mxu0 %v1747_v44  ;;  %856 = vmatprep.mubr.bf16.mxu1 %v1749_v45  ;;  %v356_v45 = vld [vmem:[#allocation2 + $0x20] sm:$0xff] }
  0x8c   : > { %793 = vmatmul.mubr.bf16.gmra.mrb[28].mxu0 %v1751_v46  ;;  %857 = vmatmul.mubr.bf16.gmra.mrb[28].mxu1 %v1752_v47  ;;  %v372_v46 = vld [vmem:[#allocation2 + $0xa0] sm:$0xff] }
 0x127   : > { %v1519_v49 = vpop.f32.mrb[0].mxu0  ;;  %v1567_v50 = vpop.f32.mrb[0].mxu1 }
 0x128   : > { %v1520_v52 = vpop.f32.mrb[1].mxu0  ;;  %v1568_v54 = vpop.f32.mrb[1].mxu1 }
 0x129   : > { %v1521_v55 = vadd.f32 %v1520_v52, %v1519_v49  ;;  %v1569_v56 = vadd.f32 %v1568_v54, %v1567_v50  ;;  %v1522_v57 = vpop.f32.mrb[2].mxu0  ;;  %v1570_v58 = vpop.f32.mrb[2].mxu1 }
 0x12a   : > { %v1523_v60 = vpop.f32.mrb[3].mxu0  ;;  %v1571_v62 = vpop.f32.mrb[3].mxu1 }
 0x12b   : > { %v865_v63 = vadd.f32 %v1521_v55, %v352_v51  ;;  %v881_v0 = vadd.f32 %v1569_v56, %v368_v53  ;;  %v1524_v1 = vadd.f32 %v1523_v60, %v1522_v57  ;;  %v1572_v2 = vadd.f32 %v1571_v62, %v1570_v58  ;;  %v357_v57 = vld [vmem:[#allocation2 + $0x28] sm:$0xff] }
 0x12c   : > { %v373_v58 = vld [vmem:[#allocation2 + $0xa8] sm:$0xff] }
 0x12d   : > { %898 = vst.msk [vmem:[#allocation2] sm:$0xff] %vm319_vm0, %v865_v63  ;;  %914 = vst.msk [vmem:[#allocation2 + $0x80] sm:$0xff] %vm319_vm0, %v881_v0  ;;  %v866_v3 = vadd.f32 %v1524_v1, %v353_v59  ;;  %v882_v4 = vadd.f32 %v1572_v2, %v369_v61 }
 0x12f   : > { %899 = vst.msk [vmem:[#allocation2 + $0x8] sm:$0xff] %vm319_vm0, %v866_v3  ;;  %915 = vst.msk [vmem:[#allocation2 + $0x88] sm:$0xff] %vm319_vm0, %v882_v4  ;;  %v1525_v5 = vpop.f32.mrb[4].mxu0  ;;  %v1573_v6 = vpop.f32.mrb[4].mxu1 }
 0x130   : > { %v1526_v8 = vpop.f32.mrb[5].mxu0  ;;  %v1574_v10 = vpop.f32.mrb[5].mxu1 }
 0x131   : > { %v1527_v11 = vadd.f32 %v1526_v8, %v1525_v5  ;;  %v1575_v12 = vadd.f32 %v1574_v10, %v1573_v6  ;;  %v1528_v13 = vpop.f32.mrb[6].mxu0  ;;  %v1576_v14 = vpop.f32.mrb[6].mxu1 }
 0x132   : > { %v1529_v17 = vpop.f32.mrb[7].mxu0  ;;  %v1577_v19 = vpop.f32.mrb[7].mxu1 }
 0x133   : > { %v867_v20 = vadd.f32 %v1527_v11, %v354_v7  ;;  %v883_v21 = vadd.f32 %v1575_v12, %v370_v9  ;;  %v1530_v22 = vadd.f32 %v1529_v17, %v1528_v13  ;;  %v1578_v23 = vadd.f32 %v1577_v19, %v1576_v14 }
 0x134   : > { %v933_v24 = vld [vmem:[#allocation2] sm:$0xff] }
 0x135   : > { %v949_v26 = vld [vmem:[#allocation2 + $0x80] sm:$0xff]  ;;  %v972_v27 = vmul.f32 %v2091_v15, %v933_v24  ;;  %900 = vst.msk [vmem:[#allocation2 + $0x10] sm:$0xff] %vm319_vm0, %v867_v20  ;;  %916 = vst.msk [vmem:[#allocation2 + $0x90] sm:$0xff] %vm319_vm0, %v883_v21  ;;  %v868_v29 = vadd.f32 %v1530_v22, %v355_v16  ;;  %v884_v30 = vadd.f32 %v1578_v23, %v371_v18  ;;  %v358_v22 = vld [vmem:[#allocation2 + $0x30] sm:$0xff] }
 0x136   : > { %v988_v28 = vmul.f32 %v2091_v15, %v949_v26  ;;  %v934_v31 = vld [vmem:[#allocation2 + $0x8] sm:$0xff]  ;;  %v374_v23 = vld [vmem:[#allocation2 + $0xb0] sm:$0xff] }
 0x137   : > { %v950_v32 = vld [vmem:[#allocation2 + $0x88] sm:$0xff]  ;;  %v1011_v33 = vadd.f32 %v2100_v25, %v972_v27  ;;  %v973_v35 = vmul.f32 %v2091_v15, %v934_v31  ;;  %901 = vst.msk [vmem:[#allocation2 + $0x18] sm:$0xff] %vm319_vm0, %v868_v29  ;;  %917 = vst.msk [vmem:[#allocation2 + $0x98] sm:$0xff] %vm319_vm0, %v884_v30  ;;  %v1531_v37 = vpop.f32.mrb[8].mxu0  ;;  %v1579_v38 = vpop.f32.mrb[8].mxu1 }
 0x138   : > { %v1027_v34 = vadd.f32 %v2100_v25, %v988_v28  ;;  %v989_v36 = vmul.f32 %v2091_v15, %v950_v32  ;;  %v1532_v39 = vpop.f32.mrb[9].mxu0  ;;  %v1580_v40 = vpop.f32.mrb[9].mxu1 }
 0x139   : > { %v1043_v41 = vmax.f32 %v1011_v33, 0.0  ;;  %v1012_v43 = vadd.f32 %v2100_v25, %v973_v35  ;;  %v1534_v47 = vpop.f32.mrb[10].mxu0  ;;  %v1582_v48 = vpop.f32.mrb[10].mxu1  ;;  %v1533_v49 = vadd.f32 %v1532_v39, %v1531_v37  ;;  %v1581_v50 = vadd.f32 %v1580_v40, %v1579_v38  ;;  %v359_v35 = vld [vmem:[#allocation2 + $0x38] sm:$0xff] }
 0x13a   : > { %v1059_v42 = vmax.f32 %v1027_v34, 0.0  ;;  %v1028_v44 = vadd.f32 %v2100_v25, %v989_v36  ;;  %v1535_v51 = vpop.f32.mrb[11].mxu0  ;;  %v1583_v52 = vpop.f32.mrb[11].mxu1  ;;  %v375_v36 = vld [vmem:[#allocation2 + $0xb8] sm:$0xff] }
 0x13b   : > { %v1471_v53 = vpack.c.bf16 %v1043_v41, %v1043_v41  ;;  %v1044_v55 = vmax.f32 %v1012_v43, 0.0  ;;  %v869_v61 = vadd.f32 %v1533_v49, %v356_v45  ;;  %v885_v62 = vadd.f32 %v1581_v50, %v372_v46 }
 0x13c   : > { %v1487_v54 = vpack.c.bf16 %v1059_v42, %v1059_v42  ;;  %v1060_v56 = vmax.f32 %v1028_v44, 0.0  ;;  %v935_v59 = vld [vmem:[#allocation2 + $0x10] sm:$0xff]  ;;  %v1536_v63 = vadd.f32 %v1535_v51, %v1534_v47  ;;  %v1584_v0 = vadd.f32 %v1583_v52, %v1582_v48 }
 0x13d   : > { %v951_v60 = vld [vmem:[#allocation2 + $0x90] sm:$0xff]  ;;  %1204 = vst.msk [vmem:[%s2118_s9] sm:$0xf] %vm1203_vm1, %v1471_v53  ;;  %v1472_v1 = vpack.c.bf16 %v1044_v55, %v1044_v55  ;;  %v974_v3 = vmul.f32 %v2091_v15, %v935_v59  ;;  %v376_v59 = vld [vmem:[#allocation2 + $0xc0] sm:$0xff] }
 0x13e   : > { %1220 = vst.msk [vmem:[%s2118_s9 + $0x40] sm:$0xf] %vm1203_vm1, %v1487_v54  ;;  %v1488_v2 = vpack.c.bf16 %v1060_v56, %v1060_v56  ;;  %v990_v4 = vmul.f32 %v2091_v15, %v951_v60  ;;  %v936_v5 = vld [vmem:[#allocation2 + $0x18] sm:$0xff]  ;;  %v870_v7 = vadd.f32 %v1536_v63, %v357_v57  ;;  %v886_v8 = vadd.f32 %v1584_v0, %v373_v58  ;;  %v360_v57 = vld [vmem:[#allocation2 + $0x40] sm:$0xff] }
 0x13f   : > { %v952_v6 = vld [vmem:[#allocation2 + $0x98] sm:$0xff]  ;;  %902 = vst.msk [vmem:[#allocation2 + $0x20] sm:$0xff] %vm319_vm0, %v869_v61  ;;  %918 = vst.msk [vmem:[#allocation2 + $0xa0] sm:$0xff] %vm319_vm0, %v885_v62  ;;  %v1013_v9 = vadd.f32 %v2100_v25, %v974_v3  ;;  %v975_v11 = vmul.f32 %v2091_v15, %v936_v5  ;;  %v1537_v13 = vpop.f32.mrb[12].mxu0  ;;  %v1585_v14 = vpop.f32.mrb[12].mxu1  ;;  %v361_v5 = vld [vmem:[#allocation2 + $0x48] sm:$0xff] }
 0x140   : > { %1205 = vst.msk [vmem:[%s2118_s9 + $0x4] sm:$0xf] %vm1203_vm1, %v1472_v1  ;;  %1221 = vst.msk [vmem:[%s2118_s9 + $0x44] sm:$0xf] %vm1203_vm1, %v1488_v2  ;;  %v1029_v10 = vadd.f32 %v2100_v25, %v990_v4  ;;  %v991_v12 = vmul.f32 %v2091_v15, %v952_v6  ;;  %v1538_v16 = vpop.f32.mrb[13].mxu0  ;;  %v1586_v17 = vpop.f32.mrb[13].mxu1 }
 0x141   : > { %903 = vst.msk [vmem:[#allocation2 + $0x28] sm:$0xff] %vm319_vm0, %v870_v7  ;;  %919 = vst.msk [vmem:[#allocation2 + $0xa8] sm:$0xff] %vm319_vm0, %v886_v8  ;;  %v1045_v18 = vmax.f32 %v1013_v9, 0.0  ;;  %v1014_v20 = vadd.f32 %v2100_v25, %v975_v11  ;;  %v1540_v24 = vpop.f32.mrb[14].mxu0  ;;  %v1588_v26 = vpop.f32.mrb[14].mxu1  ;;  %v1539_v27 = vadd.f32 %v1538_v16, %v1537_v13  ;;  %v1587_v28 = vadd.f32 %v1586_v17, %v1585_v14  ;;  %v377_v7 = vld [vmem:[#allocation2 + $0xc8] sm:$0xff] }
 0x142   : > { %v1061_v19 = vmax.f32 %v1029_v10, 0.0  ;;  %v1030_v21 = vadd.f32 %v2100_v25, %v991_v12  ;;  %v1541_v29 = vpop.f32.mrb[15].mxu0  ;;  %v1589_v30 = vpop.f32.mrb[15].mxu1 }
 0x143   : > { %v1473_v31 = vpack.c.bf16 %v1045_v18, %v1045_v18  ;;  %v1046_v33 = vmax.f32 %v1014_v20, 0.0  ;;  %v871_v37 = vadd.f32 %v1539_v27, %v358_v22  ;;  %v887_v38 = vadd.f32 %v1587_v28, %v374_v23 }
 0x144   : > { %v1489_v32 = vpack.c.bf16 %v1061_v19, %v1061_v19  ;;  %v1062_v34 = vmax.f32 %v1030_v21, 0.0  ;;  %v1542_v39 = vadd.f32 %v1541_v29, %v1540_v24  ;;  %v1590_v40 = vadd.f32 %v1589_v30, %v1588_v26 }
 0x145   : > { %1206 = vst.msk [vmem:[%s2118_s9 + $0x8] sm:$0xf] %vm1203_vm1, %v1473_v31  ;;  %v1474_v41 = vpack.c.bf16 %v1046_v33, %v1046_v33 }
 0x146   : > { %1222 = vst.msk [vmem:[%s2118_s9 + $0x48] sm:$0xf] %vm1203_vm1, %v1489_v32  ;;  %v1490_v42 = vpack.c.bf16 %v1062_v34, %v1062_v34  ;;  %v937_v43 = vld [vmem:[#allocation2 + $0x20] sm:$0xff]  ;;  %v872_v47 = vadd.f32 %v1542_v39, %v359_v35  ;;  %v888_v48 = vadd.f32 %v1590_v40, %v375_v36  ;;  %v362_v35 = vld [vmem:[#allocation2 + $0x50] sm:$0xff] }
 0x147   : > { %v953_v44 = vld [vmem:[#allocation2 + $0xa0] sm:$0xff]  ;;  %v976_v45 = vmul.f32 %v2091_v15, %v937_v43  ;;  %904 = vst.msk [vmem:[#allocation2 + $0x30] sm:$0xff] %vm319_vm0, %v871_v37  ;;  %920 = vst.msk [vmem:[#allocation2 + $0xb0] sm:$0xff] %vm319_vm0, %v887_v38  ;;  %v1543_v51 = vpop.f32.mrb[16].mxu0  ;;  %v1591_v52 = vpop.f32.mrb[16].mxu1  ;;  %v378_v37 = vld [vmem:[#allocation2 + $0xd0] sm:$0xff] }
 0x148   : > { %v992_v46 = vmul.f32 %v2091_v15, %v953_v44  ;;  %1207 = vst.msk [vmem:[%s2118_s9 + $0xc] sm:$0xf] %vm1203_vm1, %v1474_v41  ;;  %1223 = vst.msk [vmem:[%s2118_s9 + $0x4c] sm:$0xf] %vm1203_vm1, %v1490_v42  ;;  %v938_v49 = vld [vmem:[#allocation2 + $0x28] sm:$0xff]  ;;  %v1544_v58 = vpop.f32.mrb[17].mxu0 }
 0x149   : > { %v954_v50 = vld [vmem:[#allocation2 + $0xa8] sm:$0xff]  ;;  %v1015_v53 = vadd.f32 %v2100_v25, %v976_v45  ;;  %v977_v55 = vmul.f32 %v2091_v15, %v938_v49  ;;  %905 = vst.msk [vmem:[#allocation2 + $0x38] sm:$0xff] %vm319_vm0, %v872_v47  ;;  %921 = vst.msk [vmem:[#allocation2 + $0xb8] sm:$0xff] %vm319_vm0, %v888_v48  ;;  %v1592_v60 = vpop.f32.mrb[17].mxu1  ;;  %v1545_v61 = vadd.f32 %v1544_v58, %v1543_v51  ;;  %v1546_v63 = vpop.f32.mrb[18].mxu0  ;;  %v363_v47 = vld [vmem:[#allocation2 + $0x58] sm:$0xff] }
 0x14a   : > { %v1031_v54 = vadd.f32 %v2100_v25, %v992_v46  ;;  %v993_v56 = vmul.f32 %v2091_v15, %v954_v50  ;;  %v1593_v62 = vadd.f32 %v1592_v60, %v1591_v52  ;;  %v1594_v0 = vpop.f32.mrb[18].mxu1  ;;  %v1547_v6 = vpop.f32.mrb[19].mxu0  ;;  %v379_v49 = vld [vmem:[#allocation2 + $0xd8] sm:$0xff] }
 0x14b   : > { %v1047_v1 = vmax.f32 %v1015_v53, 0.0  ;;  %v1016_v3 = vadd.f32 %v2100_v25, %v977_v55  ;;  %v1595_v8 = vpop.f32.mrb[19].mxu1  ;;  %v873_v9 = vadd.f32 %v1545_v61, %v360_v57  ;;  %v1548_v11 = vadd.f32 %v1547_v6, %v1546_v63 }
 0x14c   : > { %v1063_v2 = vmax.f32 %v1031_v54, 0.0  ;;  %v1032_v4 = vadd.f32 %v2100_v25, %v993_v56  ;;  %v889_v10 = vadd.f32 %v1593_v62, %v376_v59  ;;  %v1596_v12 = vadd.f32 %v1595_v8, %v1594_v0 }
 0x14d   : > { %v1475_v13 = vpack.c.bf16 %v1047_v1, %v1047_v1  ;;  %v1048_v16 = vmax.f32 %v1016_v3, 0.0  ;;  %906 = vst.msk [vmem:[#allocation2 + $0x40] sm:$0xff] %vm319_vm0, %v873_v9  ;;  %v874_v20 = vadd.f32 %v1548_v11, %v361_v5 }
 0x14e   : > { %v1491_v14 = vpack.c.bf16 %v1063_v2, %v1063_v2  ;;  %v1064_v17 = vmax.f32 %v1032_v4, 0.0  ;;  %v939_v18 = vld [vmem:[#allocation2 + $0x30] sm:$0xff]  ;;  %922 = vst.msk [vmem:[#allocation2 + $0xc0] sm:$0xff] %vm319_vm0, %v889_v10  ;;  %v890_v21 = vadd.f32 %v1596_v12, %v377_v7 }
 0x14f   : > { %v955_v19 = vld [vmem:[#allocation2 + $0xb0] sm:$0xff]  ;;  %1208 = vst.msk [vmem:[%s2118_s9 + $0x10] sm:$0xf] %vm1203_vm1, %v1475_v13  ;;  %v1476_v22 = vpack.c.bf16 %v1048_v16, %v1048_v16  ;;  %v978_v24 = vmul.f32 %v2091_v15, %v939_v18  ;;  %v1549_v29 = vpop.f32.mrb[20].mxu0  ;;  %v1597_v30 = vpop.f32.mrb[20].mxu1  ;;  %v364_v18 = vld [vmem:[#allocation2 + $0x60] sm:$0xff] }
 0x150   : > { %1224 = vst.msk [vmem:[%s2118_s9 + $0x50] sm:$0xf] %vm1203_vm1, %v1491_v14  ;;  %v1492_v23 = vpack.c.bf16 %v1064_v17, %v1064_v17  ;;  %v994_v26 = vmul.f32 %v2091_v15, %v955_v19  ;;  %v940_v27 = vld [vmem:[#allocation2 + $0x38] sm:$0xff]  ;;  %v1550_v36 = vpop.f32.mrb[21].mxu0  ;;  %v1598_v38 = vpop.f32.mrb[21].mxu1  ;;  %v380_v19 = vld [vmem:[#allocation2 + $0xe0] sm:$0xff] }
 0x151   : > { %v956_v28 = vld [vmem:[#allocation2 + $0xb8] sm:$0xff]  ;;  %907 = vst.msk [vmem:[#allocation2 + $0x48] sm:$0xff] %vm319_vm0, %v874_v20  ;;  %923 = vst.msk [vmem:[#allocation2 + $0xc8] sm:$0xff] %vm319_vm0, %v890_v21  ;;  %v1017_v31 = vadd.f32 %v2100_v25, %v978_v24  ;;  %v979_v33 = vmul.f32 %v2091_v15, %v940_v27  ;;  %v1551_v39 = vadd.f32 %v1550_v36, %v1549_v29  ;;  %v1552_v41 = vpop.f32.mrb[22].mxu0  ;;  %v1600_v42 = vpop.f32.mrb[22].mxu1 }
 0x152   : > { %1209 = vst.msk [vmem:[%s2118_s9 + $0x14] sm:$0xf] %vm1203_vm1, %v1476_v22  ;;  %1225 = vst.msk [vmem:[%s2118_s9 + $0x54] sm:$0xf] %vm1203_vm1, %v1492_v23  ;;  %v1033_v32 = vadd.f32 %v2100_v25, %v994_v26  ;;  %v995_v34 = vmul.f32 %v2091_v15, %v956_v28  ;;  %v1599_v40 = vadd.f32 %v1598_v38, %v1597_v30  ;;  %v1553_v48 = vpop.f32.mrb[23].mxu0  ;;  %v1601_v50 = vpop.f32.mrb[23].mxu1 }
 0x153   : > { %v1049_v43 = vmax.f32 %v1017_v31, 0.0  ;;  %v1018_v45 = vadd.f32 %v2100_v25, %v979_v33  ;;  %v875_v51 = vadd.f32 %v1551_v39, %v362_v35  ;;  %v1554_v53 = vadd.f32 %v1553_v48, %v1552_v41  ;;  %v365_v31 = vld [vmem:[#allocation2 + $0x68] sm:$0xff] }
 0x154   : > { %v1065_v44 = vmax.f32 %v1033_v32, 0.0  ;;  %v1034_v46 = vadd.f32 %v2100_v25, %v995_v34  ;;  %v891_v52 = vadd.f32 %v1599_v40, %v378_v37  ;;  %v1602_v54 = vadd.f32 %v1601_v50, %v1600_v42  ;;  %v941_v59 = vld [vmem:[#allocation2 + $0x40] sm:$0xff]  ;;  %v381_v32 = vld [vmem:[#allocation2 + $0xe8] sm:$0xff] }
 0x155   : > { %v1477_v55 = vpack.c.bf16 %v1049_v43, %v1049_v43  ;;  %v1050_v57 = vmax.f32 %v1018_v45, 0.0  ;;  %v957_v60 = vld [vmem:[#allocation2 + $0xc0] sm:$0xff]  ;;  %v980_v61 = vmul.f32 %v2091_v15, %v941_v59  ;;  %908 = vst.msk [vmem:[#allocation2 + $0x50] sm:$0xff] %vm319_vm0, %v875_v51  ;;  %v876_v63 = vadd.f32 %v1554_v53, %v363_v47  ;;  %v366_v59 = vld [vmem:[#allocation2 + $0x70] sm:$0xff] }
 0x156   : > { %v1493_v56 = vpack.c.bf16 %v1065_v44, %v1065_v44  ;;  %v1066_v58 = vmax.f32 %v1034_v46, 0.0  ;;  %v996_v62 = vmul.f32 %v2091_v15, %v957_v60  ;;  %924 = vst.msk [vmem:[#allocation2 + $0xd0] sm:$0xff] %vm319_vm0, %v891_v52  ;;  %v892_v0 = vadd.f32 %v1602_v54, %v379_v49  ;;  %v382_v60 = vld [vmem:[#allocation2 + $0xf0] sm:$0xff] }
 0x157   : > { %1210 = vst.msk [vmem:[%s2118_s9 + $0x18] sm:$0xf] %vm1203_vm1, %v1477_v55  ;;  %v1478_v1 = vpack.c.bf16 %v1050_v57, %v1050_v57  ;;  %v1019_v5 = vadd.f32 %v2100_v25, %v980_v61  ;;  %v1555_v9 = vpop.f32.mrb[24].mxu0  ;;  %v1603_v10 = vpop.f32.mrb[24].mxu1 }
 0x158   : > { %1226 = vst.msk [vmem:[%s2118_s9 + $0x58] sm:$0xf] %vm1203_vm1, %v1493_v56  ;;  %v1494_v2 = vpack.c.bf16 %v1066_v58, %v1066_v58  ;;  %v942_v3 = vld [vmem:[#allocation2 + $0x48] sm:$0xff]  ;;  %v1035_v6 = vadd.f32 %v2100_v25, %v996_v62  ;;  %v1556_v11 = vpop.f32.mrb[25].mxu0  ;;  %v1604_v12 = vpop.f32.mrb[25].mxu1 }
 0x159   : > { %v958_v4 = vld [vmem:[#allocation2 + $0xc8] sm:$0xff]  ;;  %v981_v7 = vmul.f32 %v2091_v15, %v942_v3  ;;  %909 = vst.msk [vmem:[#allocation2 + $0x58] sm:$0xff] %vm319_vm0, %v876_v63  ;;  %925 = vst.msk [vmem:[#allocation2 + $0xd8] sm:$0xff] %vm319_vm0, %v892_v0  ;;  %v1051_v13 = vmax.f32 %v1019_v5, 0.0  ;;  %v1558_v20 = vpop.f32.mrb[26].mxu0  ;;  %v1606_v21 = vpop.f32.mrb[26].mxu1  ;;  %v1557_v22 = vadd.f32 %v1556_v11, %v1555_v9  ;;  %v1605_v23 = vadd.f32 %v1604_v12, %v1603_v10 }
 0x15a   : > { %v997_v8 = vmul.f32 %v2091_v15, %v958_v4  ;;  %1211 = vst.msk [vmem:[%s2118_s9 + $0x1c] sm:$0xf] %vm1203_vm1, %v1478_v1  ;;  %1227 = vst.msk [vmem:[%s2118_s9 + $0x5c] sm:$0xf] %vm1203_vm1, %v1494_v2  ;;  %v1067_v14 = vmax.f32 %v1035_v6, 0.0  ;;  %v1559_v24 = vpop.f32.mrb[27].mxu0 }
 0x15b   : > { %v1020_v16 = vadd.f32 %v2100_v25, %v981_v7  ;;  %v1607_v26 = vpop.f32.mrb[27].mxu1  ;;  %v1479_v27 = vpack.c.bf16 %v1051_v13, %v1051_v13  ;;  %v877_v35 = vadd.f32 %v1557_v22, %v364_v18  ;;  %v893_v36 = vadd.f32 %v1605_v23, %v380_v19  ;;  %v367_v7 = vld [vmem:[#allocation2 + $0x78] sm:$0xff] }
 0x15c   : > { %v1036_v17 = vadd.f32 %v2100_v25, %v997_v8  ;;  %v1495_v28 = vpack.c.bf16 %v1067_v14, %v1067_v14  ;;  %v943_v33 = vld [vmem:[#allocation2 + $0x50] sm:$0xff]  ;;  %v1560_v37 = vadd.f32 %v1559_v24, %v1558_v20  ;;  %v1608_v38 = vadd.f32 %v1607_v26, %v1606_v21  ;;  %v383_v8 = vld [vmem:[#allocation2 + $0xf8] sm:$0xff] }
 0x15d   : > { %v1052_v29 = vmax.f32 %v1020_v16, 0.0  ;;  %v959_v34 = vld [vmem:[#allocation2 + $0xd0] sm:$0xff]  ;;  %1212 = vst.msk [vmem:[%s2118_s9 + $0x20] sm:$0xf] %vm1203_vm1, %v1479_v27  ;;  %v982_v41 = vmul.f32 %v2091_v15, %v943_v33 }
 0x15e   : > { %v1068_v30 = vmax.f32 %v1036_v17, 0.0  ;;  %1228 = vst.msk [vmem:[%s2118_s9 + $0x60] sm:$0xf] %vm1203_vm1, %v1495_v28  ;;  %v998_v42 = vmul.f32 %v2091_v15, %v959_v34  ;;  %v878_v45 = vadd.f32 %v1560_v37, %v365_v31  ;;  %v894_v46 = vadd.f32 %v1608_v38, %v381_v32 }
 0x15f   : > { %v1480_v39 = vpack.c.bf16 %v1052_v29, %v1052_v29  ;;  %910 = vst.msk [vmem:[#allocation2 + $0x60] sm:$0xff] %vm319_vm0, %v877_v35  ;;  %926 = vst.msk [vmem:[#allocation2 + $0xe0] sm:$0xff] %vm319_vm0, %v893_v36  ;;  %v1021_v47 = vadd.f32 %v2100_v25, %v982_v41  ;;  %v1561_v51 = vpop.f32.mrb[28].mxu0  ;;  %v1609_v52 = vpop.f32.mrb[28].mxu1 }
 0x160   : > { %v1496_v40 = vpack.c.bf16 %v1068_v30, %v1068_v30  ;;  %v944_v43 = vld [vmem:[#allocation2 + $0x58] sm:$0xff]  ;;  %v1037_v48 = vadd.f32 %v2100_v25, %v998_v42  ;;  %911 = vst.msk [vmem:[#allocation2 + $0x68] sm:$0xff] %vm319_vm0, %v878_v45  ;;  %927 = vst.msk [vmem:[#allocation2 + $0xe8] sm:$0xff] %vm319_vm0, %v894_v46  ;;  %v1562_v53 = vpop.f32.mrb[29].mxu0  ;;  %v1610_v54 = vpop.f32.mrb[29].mxu1 }
 0x161   : > { %v960_v44 = vld [vmem:[#allocation2 + $0xd8] sm:$0xff]  ;;  %1213 = vst.msk [vmem:[%s2118_s9 + $0x24] sm:$0xf] %vm1203_vm1, %v1480_v39  ;;  %v983_v49 = vmul.f32 %v2091_v15, %v944_v43  ;;  %v1053_v55 = vmax.f32 %v1021_v47, 0.0  ;;  %v1564_v61 = vpop.f32.mrb[30].mxu0  ;;  %v1612_v62 = vpop.f32.mrb[30].mxu1  ;;  %v1563_v63 = vadd.f32 %v1562_v53, %v1561_v51  ;;  %v1611_v0 = vadd.f32 %v1610_v54, %v1609_v52 }
 0x162   : > { %1229 = vst.msk [vmem:[%s2118_s9 + $0x64] sm:$0xf] %vm1203_vm1, %v1496_v40  ;;  %v999_v50 = vmul.f32 %v2091_v15, %v960_v44  ;;  %v1069_v56 = vmax.f32 %v1037_v48, 0.0  ;;  %v1565_v1 = vpop.f32.mrb[31].mxu0  ;;  %v1613_v2 = vpop.f32.mrb[31].mxu1 }
 0x163   : > { %v1022_v57 = vadd.f32 %v2100_v25, %v983_v49  ;;  %v1481_v3 = vpack.c.bf16 %v1053_v55, %v1053_v55  ;;  %v879_v9 = vadd.f32 %v1563_v63, %v366_v59  ;;  %v895_v10 = vadd.f32 %v1611_v0, %v382_v60 }
 0x164   : > { %v1038_v58 = vadd.f32 %v2100_v25, %v999_v50  ;;  %v1497_v4 = vpack.c.bf16 %v1069_v56, %v1069_v56  ;;  %v1566_v11 = vadd.f32 %v1565_v1, %v1564_v61  ;;  %v1614_v12 = vadd.f32 %v1613_v2, %v1612_v62 }
 0x165   : > { %v1054_v5 = vmax.f32 %v1022_v57, 0.0  ;;  %1214 = vst.msk [vmem:[%s2118_s9 + $0x28] sm:$0xf] %vm1203_vm1, %v1481_v3 }
 0x166   : > { %v1070_v6 = vmax.f32 %v1038_v58, 0.0  ;;  %1230 = vst.msk [vmem:[%s2118_s9 + $0x68] sm:$0xf] %vm1203_vm1, %v1497_v4  ;;  %v945_v16 = vld [vmem:[#allocation2 + $0x60] sm:$0xff]  ;;  %v880_v20 = vadd.f32 %v1566_v11, %v367_v7  ;;  %v896_v21 = vadd.f32 %v1614_v12, %v383_v8 }
 0x167   : > { %v1482_v13 = vpack.c.bf16 %v1054_v5, %v1054_v5  ;;  %v961_v17 = vld [vmem:[#allocation2 + $0xe0] sm:$0xff]  ;;  %v984_v18 = vmul.f32 %v2091_v15, %v945_v16  ;;  %912 = vst.msk [vmem:[#allocation2 + $0x70] sm:$0xff] %vm319_vm0, %v879_v9  ;;  %928 = vst.msk [vmem:[#allocation2 + $0xf0] sm:$0xff] %vm319_vm0, %v895_v10  ;;  %v946_v22 = vld [vmem:[#allocation2 + $0x68] sm:$0xff] }
 0x168   : > { %v1498_v14 = vpack.c.bf16 %v1070_v6, %v1070_v6  ;;  %v1000_v19 = vmul.f32 %v2091_v15, %v961_v17  ;;  %v962_v23 = vld [vmem:[#allocation2 + $0xe8] sm:$0xff]  ;;  %v985_v27 = vmul.f32 %v2091_v15, %v946_v22  ;;  %913 = vst.msk [vmem:[#allocation2 + $0x78] sm:$0xff] %vm319_vm0, %v880_v20  ;;  %929 = vst.msk [vmem:[#allocation2 + $0xf8] sm:$0xff] %vm319_vm0, %v896_v21 }
 0x169   : > { %1215 = vst.msk [vmem:[%s2118_s9 + $0x2c] sm:$0xf] %vm1203_vm1, %v1482_v13  ;;  %v1023_v24 = vadd.f32 %v2100_v25, %v984_v18  ;;  %v1001_v28 = vmul.f32 %v2091_v15, %v962_v23 }
 0x16a   : > { %1231 = vst.msk [vmem:[%s2118_s9 + $0x6c] sm:$0xf] %vm1203_vm1, %v1498_v14  ;;  %v1039_v26 = vadd.f32 %v2100_v25, %v1000_v19  ;;  %v1024_v31 = vadd.f32 %v2100_v25, %v985_v27 }
 0x16b   : > { %v1055_v29 = vmax.f32 %v1023_v24, 0.0  ;;  %v1040_v32 = vadd.f32 %v2100_v25, %v1001_v28 }
 0x16c   : > { %v1071_v30 = vmax.f32 %v1039_v26, 0.0  ;;  %v1056_v35 = vmax.f32 %v1024_v31, 0.0 }
 0x16d   : > { %v1483_v33 = vpack.c.bf16 %v1055_v29, %v1055_v29  ;;  %v1072_v36 = vmax.f32 %v1040_v32, 0.0 }
 0x16e   : > { %v1499_v34 = vpack.c.bf16 %v1071_v30, %v1071_v30  ;;  %v947_v37 = vld [vmem:[#allocation2 + $0x70] sm:$0xff]  ;;  %v1484_v39 = vpack.c.bf16 %v1056_v35, %v1056_v35 }
 0x16f   : > { %v963_v38 = vld [vmem:[#allocation2 + $0xf0] sm:$0xff]  ;;  %1216 = vst.msk [vmem:[%s2118_s9 + $0x30] sm:$0xf] %vm1203_vm1, %v1483_v33  ;;  %v1500_v40 = vpack.c.bf16 %v1072_v36, %v1072_v36  ;;  %v986_v41 = vmul.f32 %v2091_v15, %v947_v37  ;;  %v948_v43 = vld [vmem:[#allocation2 + $0x78] sm:$0xff] }
 0x170   : > { %1232 = vst.msk [vmem:[%s2118_s9 + $0x70] sm:$0xf] %vm1203_vm1, %v1499_v34  ;;  %v1002_v42 = vmul.f32 %v2091_v15, %v963_v38  ;;  %v964_v44 = vld [vmem:[#allocation2 + $0xf8] sm:$0xff]  ;;  %1217 = vst.msk [vmem:[%s2118_s9 + $0x34] sm:$0xf] %vm1203_vm1, %v1484_v39  ;;  %v987_v47 = vmul.f32 %v2091_v15, %v948_v43 }
 0x171   : > { %1233 = vst.msk [vmem:[%s2118_s9 + $0x74] sm:$0xf] %vm1203_vm1, %v1500_v40  ;;  %v1025_v45 = vadd.f32 %v2100_v25, %v986_v41  ;;  %v1003_v48 = vmul.f32 %v2091_v15, %v964_v44 }
 0x172   : > { %v1041_v46 = vadd.f32 %v2100_v25, %v1002_v42  ;;  %v1026_v51 = vadd.f32 %v2100_v25, %v987_v47 }
 0x173   : > { %v1057_v49 = vmax.f32 %v1025_v45, 0.0  ;;  %v1042_v52 = vadd.f32 %v2100_v25, %v1003_v48 }
 0x174   : > { %v1073_v50 = vmax.f32 %v1041_v46, 0.0  ;;  %v1058_v55 = vmax.f32 %v1026_v51, 0.0 }
 0x175   : > { %v1485_v53 = vpack.c.bf16 %v1057_v49, %v1057_v49  ;;  %v1074_v56 = vmax.f32 %v1042_v52, 0.0 }
 0x176   : > { %v1501_v54 = vpack.c.bf16 %v1073_v50, %v1073_v50  ;;  %v1486_v57 = vpack.c.bf16 %v1058_v55, %v1058_v55 }
 0x177   : > { %1218 = vst.msk [vmem:[%s2118_s9 + $0x38] sm:$0xf] %vm1203_vm1, %v1485_v53  ;;  %v1502_v58 = vpack.c.bf16 %v1074_v56, %v1074_v56 }
 0x178   : > { %1234 = vst.msk [vmem:[%s2118_s9 + $0x78] sm:$0xf] %vm1203_vm1, %v1501_v54  ;;  %1219 = vst.msk [vmem:[%s2118_s9 + $0x3c] sm:$0xf] %vm1203_vm1, %v1486_v57 }
 0x179   : > { %1235 = vst.msk [vmem:[%s2118_s9 + $0x7c] sm:$0xf] %vm1203_vm1, %v1502_v58 }
 0x17a PF: > { %s17_s20 = sadd.s32 1, %s1833_s20   ;;  %s2291_s15 = smov %s1817_s16 }
 0x17b   : > { %p14_p9 = scmp.ge.s32.totalorder %s17_s20, 4   ;;  %s2292_s16 = smov %s1821_s17 }
 0x17c   : > { %s2293_s17 = smov %s1913_s27  ;;  %s2294_s18 = smov %s1829_s19 }
 0x17d   : > { %s2295_s19 = smov %s2297_s22  ;;  %16 = sbr.rel (!%p14_p9) target bundleno = 4 (0x4), region = 93 }
 0x184   :  { %1264 = vsyncpa [#allocation4], 1 }
 0x185   :  { %1266 = vsyncpa [#allocation4 + $0x1], 1 }

</bundles_post_ra>
